<compile_context>
chip_gen: v6e
topology: v6e:2x2x1
jax: 0.10.0
libtpu: 0.0.40
codegen_flags: <defaults>
</compile_context>

<pallas_src>
import functools

import jax
import jax.numpy as jnp
from jax.experimental import pallas as pl
from jax.experimental.pallas import tpu as pltpu


def _projector_kernel(x_ref, w_ref, b_ref, o_ref):
    # x_ref: (tm, K) bf16   w_ref: (N, K) bf16   b_ref: (1, N) bf16
    # bf16 operands directly on the MXU, f32 accumulation; contraction on the
    # last dims avoids needing a pre-transposed weight.
    y = jax.lax.dot_general(
        x_ref[...], w_ref[...],
        dimension_numbers=(((1,), (1,)), ((), ())),
        preferred_element_type=jnp.float32,
    )                                                  # (tm, N) f32
    y = y + b_ref[...].astype(jnp.float32)

    # Exact GELU (PyTorch nn.GELU() default): 0.5*x*(1+erf(x/sqrt(2)))
    inv_sqrt2 = jnp.float32(0.7071067811865476)
    y = 0.5 * y * (1.0 + jax.lax.erf(y * inv_sqrt2))

    # Match the bf16 module output of linear+gelu, then normalize along the
    # last dim. rsqrt + multiply keeps the reciprocal on the EUP slot.
    y_bf = y.astype(jnp.bfloat16).astype(jnp.float32)
    ssq = jnp.sum(y_bf * y_bf, axis=-1, keepdims=True)
    o_ref[...] = (y_bf * jax.lax.rsqrt(ssq)).astype(o_ref.dtype)


def _round_up(x, m):
    return (x + m - 1) // m * m


@functools.partial(jax.jit, static_argnames=("block_m",))
def cpm_qwen_projector(x, weight, bias, *, block_m=256):
    """x: (..., cpm_dim) bf16; weight: (qwen_dim, cpm_dim) bf16 (nn.Linear layout);
    bias: (qwen_dim,) bf16."""
    cpm_dim = x.shape[-1]
    qwen_dim = weight.shape[0]
    lead = x.shape[:-1]

    x2 = x.reshape(-1, cpm_dim)                       # (M, K)
    M = x2.shape[0]

    # --- tile / padding choices (all static under jit) ----------------------
    # bf16 packs 16 rows per sublane group -> keep row tiles a multiple of 16.
    block_m_eff = min(block_m, _round_up(max(M, 1), 16))
    M_pad = _round_up(M, block_m_eff)
    N_pad = _round_up(qwen_dim, 128)                  # lane-dense output slab

    if M_pad != M:
        x2 = jnp.pad(x2, ((0, M_pad - M), (0, 0)))
    w = weight
    b = bias
    if N_pad != qwen_dim:
        # zero weight rows + zero bias -> gelu(0) = 0 exactly, norm unchanged
        w = jnp.pad(w, ((0, N_pad - qwen_dim), (0, 0)))
        b = jnp.pad(b, ((0, N_pad - qwen_dim),))
    b2 = b.reshape(1, N_pad)

    grid_m = M_pad // block_m_eff

    # --- VMEM budget (bf16 weight resident; x/out tiles double-buffered) ----
    w_bytes = 2 * N_pad * cpm_dim * 2                 # allow double-buffer
    b_bytes = 2 * N_pad * 2
    x_tile = 2 * block_m_eff * cpm_dim * 2
    o_tile = 2 * block_m_eff * N_pad * 2
    f32_tmp = 4 * block_m_eff * N_pad * 4             # epilogue intermediates
    needed = w_bytes + b_bytes + x_tile + o_tile + f32_tmp + (2 << 20)
    vmem_limit = int(min(max(needed, 32 << 20), 64 << 20))  # cap for v7x VMEM

    out = pl.pallas_call(
        _projector_kernel,
        out_shape=jax.ShapeDtypeStruct((M_pad, N_pad), jnp.bfloat16),
        grid_spec=pltpu.PrefetchScalarGridSpec(
            num_scalar_prefetch=0,
            grid=(grid_m,),
            in_specs=[
                pl.BlockSpec((block_m_eff, cpm_dim), lambda i: (i, 0)),
                # Constant-index blocks: Pallas only re-fetches when the block
                # index changes, so the weight/bias are DMA'd once.
                pl.BlockSpec((N_pad, cpm_dim), lambda i: (0, 0)),
                pl.BlockSpec((1, N_pad), lambda i: (0, 0)),
            ],
            out_specs=pl.BlockSpec((block_m_eff, N_pad), lambda i: (i, 0)),
        ),
        compiler_params=pltpu.CompilerParams(
            dimension_semantics=("parallel",),   # lets v7x split M across TCs
            vmem_limit_bytes=vmem_limit,
        ),
    )(x2, w, b2)

    out = out[:M, :qwen_dim]
    return out.reshape(*lead, qwen_dim)


def _init_params(key, cpm_dim, qwen_dim):
    # xavier_normal_: std = sqrt(2 / (fan_in + fan_out)); bias = 0; dtype bf16.
    std = (2.0 / (cpm_dim + qwen_dim)) ** 0.5
    w = jax.random.normal(key, (qwen_dim, cpm_dim), dtype=jnp.float32) * std
    b = jnp.zeros((qwen_dim,), dtype=jnp.float32)
    return w.astype(jnp.bfloat16), b.astype(jnp.bfloat16)


if __name__ == "__main__":
    cpm_dim, qwen_dim = 32, 64
    batch, seq = 2, 8

    key = jax.random.PRNGKey(0)
    k_x, k_w = jax.random.split(key)

    x = jax.random.normal(k_x, (batch, seq, cpm_dim), dtype=jnp.float32).astype(jnp.bfloat16)
    weight, bias = _init_params(k_w, cpm_dim, qwen_dim)

    out = cpm_qwen_projector(x, weight, bias)
    out = jax.block_until_ready(out)

    # quick sanity: shape matches, rows are unit-norm, output is bf16
    assert out.shape == (batch, seq, qwen_dim)
    assert out.dtype == jnp.bfloat16
    norms = jnp.linalg.norm(out.astype(jnp.float32), axis=-1)
    assert bool(jnp.all(jnp.abs(norms - 1.0) < 1e-1))

    # reference check against plain JAX (same bf16 rounding points)
    y_ref = (x.astype(jnp.float32).reshape(-1, cpm_dim)
             @ weight.astype(jnp.float32).T + bias.astype(jnp.float32))
    y_ref = 0.5 * y_ref * (1.0 + jax.lax.erf(y_ref * 0.7071067811865476))
    y_ref = y_ref.astype(jnp.bfloat16).astype(jnp.float32)
    ref = (y_ref / jnp.linalg.norm(y_ref, axis=-1, keepdims=True)).reshape(batch, seq, qwen_dim)
    assert bool(jnp.all(jnp.abs(out.astype(jnp.float32) - ref) < 2e-2))

    print("KERNEL_OK")
</pallas_src>

<mosaic_0001>
module attributes {stable_mosaic.version = 11 : i64} {
  func.func @_projector_kernel(%arg0: i32, %arg1: memref<16x32xbf16, #tpu.memory_space<vmem>>, %arg2: memref<128x32xbf16, #tpu.memory_space<vmem>>, %arg3: memref<1x128xbf16, #tpu.memory_space<vmem>>, %arg4: memref<16x128xbf16, #tpu.memory_space<vmem>>) attributes {dimension_semantics = [#tpu.dimension_semantics<parallel>], iteration_bounds = array<i64: 1>, scalar_prefetch = 0 : i64, scratch_operands = 0 : i64, tpu.core_type = #tpu.core_type<tc>, window_params = [{transform_indices = @transform_0, window_bounds = array<i64: 16, 32>}, {pipeline_mode = #tpu.pipeline_mode<synchronous>, transform_indices = @transform_1, window_bounds = array<i64: 128, 32>}, {pipeline_mode = #tpu.pipeline_mode<synchronous>, transform_indices = @transform_2, window_bounds = array<i64: 1, 128>}, {transform_indices = @transform_3, window_bounds = array<i64: 16, 128>}]} {
    %c0 = arith.constant 0 : index
    %c0_0 = arith.constant 0 : index
    %0 = vector.load %arg1[%c0, %c0_0] : memref<16x32xbf16, #tpu.memory_space<vmem>>, vector<16x32xbf16>
    %c0_1 = arith.constant 0 : index
    %c0_2 = arith.constant 0 : index
    %1 = vector.load %arg2[%c0_1, %c0_2] : memref<128x32xbf16, #tpu.memory_space<vmem>>, vector<128x32xbf16>
    %cst = arith.constant dense<0.000000e+00> : vector<16x128xf32>
    %2 = tpu.matmul %0, %1, %cst {dimension_numbers = #tpu.dot_dimension_numbers<[1], [1], [0], [0], [0, 0, 1, 0], [], []>} : vector<16x32xbf16>, vector<128x32xbf16>, vector<16x128xf32> -> vector<16x128xf32>
    %c0_3 = arith.constant 0 : index
    %c0_4 = arith.constant 0 : index
    %3 = vector.load %arg3[%c0_3, %c0_4] : memref<1x128xbf16, #tpu.memory_space<vmem>>, vector<1x128xbf16>
    %4 = arith.extf %3 : vector<1x128xbf16> to vector<1x128xf32>
    %5 = vector.broadcast %4 : vector<1x128xf32> to vector<16x128xf32>
    %6 = arith.addf %2, %5 : vector<16x128xf32>
    %cst_5 = arith.constant 5.000000e-01 : f32
    %7 = vector.broadcast %cst_5 : f32 to vector<16x128xf32>
    %8 = arith.mulf %7, %6 : vector<16x128xf32>
    %cst_6 = arith.constant 0.707106769 : f32
    %9 = vector.broadcast %cst_6 : f32 to vector<16x128xf32>
    %10 = arith.mulf %6, %9 : vector<16x128xf32>
    %11 = math.erf %10 : vector<16x128xf32>
    %cst_7 = arith.constant 1.000000e+00 : f32
    %12 = vector.broadcast %cst_7 : f32 to vector<16x128xf32>
    %13 = arith.addf %12, %11 : vector<16x128xf32>
    %14 = arith.mulf %8, %13 : vector<16x128xf32>
    %15 = arith.truncf %14 : vector<16x128xf32> to vector<16x128xbf16>
    %16 = arith.extf %15 : vector<16x128xbf16> to vector<16x128xf32>
    %17 = arith.mulf %16, %16 : vector<16x128xf32>
    %cst_8 = arith.constant dense<0.000000e+00> : vector<16xf32>
    %18 = vector.multi_reduction <add>, %17, %cst_8 [1] : vector<16x128xf32> to vector<16xf32>
    %19 = vector.shape_cast %18 : vector<16xf32> to vector<16x1xf32>
    %20 = math.rsqrt %19 : vector<16x1xf32>
    %21 = vector.broadcast %20 : vector<16x1xf32> to vector<16x128xf32>
    %22 = arith.mulf %16, %21 : vector<16x128xf32>
    %23 = arith.truncf %22 : vector<16x128xf32> to vector<16x128xbf16>
    %c0_9 = arith.constant 0 : index
    %c0_10 = arith.constant 0 : index
    %24 = vector.load %arg4[%c0_9, %c0_10] : memref<16x128xbf16, #tpu.memory_space<vmem>>, vector<16x128xbf16>
    tpu.vector_store %arg4[%c0_9, %c0_10], %23 {strides = array<i32>} : memref<16x128xbf16, #tpu.memory_space<vmem>>, vector<16x128xbf16>,
    return
  }
  func.func @transform_0(%arg0: i32) -> (i32, i32) {
    %c0_i32 = arith.constant 0 : i32
    %c0_i32_0 = arith.constant 0 : i32
    return %arg0, %c0_i32 : i32, i32
  }
  func.func @transform_1(%arg0: i32) -> (i32, i32) {
    %c0_i32 = arith.constant 0 : i32
    %c0_i32_0 = arith.constant 0 : i32
    %c0_i32_1 = arith.constant 0 : i32
    return %c0_i32, %c0_i32_0 : i32, i32
  }
  func.func @transform_2(%arg0: i32) -> (i32, i32) {
    %c0_i32 = arith.constant 0 : i32
    %c0_i32_0 = arith.constant 0 : i32
    %c0_i32_1 = arith.constant 0 : i32
    return %c0_i32, %c0_i32_0 : i32, i32
  }
  func.func @transform_3(%arg0: i32) -> (i32, i32) {
    %c0_i32 = arith.constant 0 : i32
    %c0_i32_0 = arith.constant 0 : i32
    return %arg0, %c0_i32 : i32, i32
  }
}

</mosaic_0001>

<bundles_post_ra>
// kernel: cpm_qwen_projector.1
= control target key start
LH: loop header
LB: loop body
LE: loop exit
PB: predicated region body
PF: predicated region fallthrough
CT: control target
= control target key end

     0   :  { %vm84_vm0 = vcmask 261120   ;;  %v257_v0 = vmov 0.0   ;;  %vm258_vm1 = vmmov 0   ;;  %v35_v18 = vlaneseq  ;;  %s321_s1 = inlined_call_operand.vmem [shape: bf16[128,32], index: 1, kind: input, shape index: {}]   ;;  %s322_s0 = inlined_call_operand.vmem [shape: bf16[16,32], index: 0, kind: input, shape index: {}]   ;;  %s323_s2 = inlined_call_operand.vmem [shape: bf16[1,128], index: 2, kind: input, shape index: {}]   ;;  %s324_s3 = inlined_call_operand.vmem [shape: bf16[16,128], index: 3, kind: output, shape index: {}]  }
   0x1   :  { %218 = vmatprep.subr.bf16.mxu0 %v257_v0  ;;  %v240_v1 = vld [vmem:[%s321_s1 + $0x38] sm:$0xff]   ;;  %234 = vmatprep.mubr.msk.bf16.mxu0 %vm258_vm1, %v257_v0  ;;  %v241_v3 = vld [vmem:[%s321_s1 + $0x30] sm:$0xff]   ;;  %v242_v5 = vld [vmem:[%s321_s1 + $0x28] sm:$0xff]  }
   0x2   :  { %v110_v2 = vsel %vm84_vm0, %v240_v1, 0  ;;  %v107_v4 = vsel %vm84_vm0, %v241_v3, 0  ;;  %v104_v6 = vsel %vm84_vm0, %v242_v5, 0  ;;  %v243_v7 = vld [vmem:[%s321_s1 + $0x20] sm:$0xff]   ;;  %v244_v9 = vld [vmem:[%s321_s1 + $0x18] sm:$0xff]   ;;  %v245_v11 = vld [vmem:[%s321_s1 + $0x10] sm:$0xff]  }
   0x3   :  { %219 = vmatpush3.bf16.xpose.msra.mxu0 %v110_v2  ;;  %v101_v8 = vsel %vm84_vm0, %v243_v7, 0  ;;  %v98_v10 = vsel %vm84_vm0, %v244_v9, 0  ;;  %v95_v12 = vsel %vm84_vm0, %v245_v11, 0  ;;  %v246_v13 = vld [vmem:[%s321_s1 + $0x8] sm:$0xff]   ;;  %v247_v15 = vld [vmem:[%s321_s1] sm:$0xff]   ;;  %v36_v19 = vshrl.u32 %v35_v18, 7 }
   0x4   :  { %220 = vmatprep.subr.bf16.mxu0 %v257_v0  ;;  %v92_v14 = vsel %vm84_vm0, %v246_v13, 0  ;;  %v89_v16 = vsel %vm84_vm0, %v247_v15, 0  ;;  %v248_v17 = vld [vmem:[%s322_s0] sm:$0xff]  }
   0x5   :  { %v33_v20 = vld [vmem:[%s323_s2] sm:$0x1]  ;;  %v37_v22 = vsub.s32 0, %v36_v19 }
   0x6   :  { %v34_v21 = vunpack.c.l.bf16 %v33_v20 }
   0x8   :  { %v38_v23 = vrot.slane %v34_v21, %v37_v22 }
   0xb   :  { %221 = vmatpush3.bf16.xpose.msra.mxu0 %v107_v4 }
   0xc   :  { %222 = vmatprep.subr.bf16.mxu0 %v257_v0 }
  0x13   :  { %223 = vmatpush3.bf16.xpose.msra.mxu0 %v104_v6 }
  0x14   :  { %224 = vmatprep.subr.bf16.mxu0 %v257_v0 }
  0x1b   :  { %225 = vmatpush3.bf16.xpose.msra.mxu0 %v101_v8 }
  0x1c   :  { %226 = vmatprep.subr.bf16.mxu0 %v257_v0 }
  0x23   :  { %227 = vmatpush3.bf16.xpose.msra.mxu0 %v98_v10 }
  0x24   :  { %228 = vmatprep.subr.bf16.mxu0 %v257_v0 }
  0x2b   :  { %229 = vmatpush3.bf16.xpose.msra.mxu0 %v95_v12 }
  0x2c   :  { %230 = vmatprep.subr.bf16.mxu0 %v257_v0 }
  0x33   :  { %231 = vmatpush3.bf16.xpose.msra.mxu0 %v92_v14 }
  0x34   :  { %232 = vmatprep.subr.bf16.mxu0 %v257_v0 }
  0x3b   :  { %233 = vmatpush3.bf16.xpose.msra.mxu0 %v89_v16 }
  0x42   :  { %235 = vmatmul.mubr.msk.bf16.vlgmr.msra.gmra.mxu0 %vm84_vm0, %v248_v17 }
 0x102   :  { %v146_v24 = vpop.f32.mrf.mxu0 }
 0x103   :  { %v147_v25 = vadd.f32 %v146_v24, %v38_v23 }
 0x104   :  { %v236_v26 = vpop.f32.mrf.mxu0 }
 0x105   :  { %v155_v27 = vmul.f32 0.70710677, %v147_v25  ;;  %v153_v35 = vmul.f32 0.5, %v147_v25 }
 0x106   :  { %v149_v28 = vpop.f32.mrf.mxu0 }
 0x107   :  { %249 = verf.f32 %v155_v27  ;;  %v150_v29 = vadd.f32 %v149_v28, %v38_v23 }
 0x108   :  { %v237_v30 = vpop.f32.mrf.mxu0 }
 0x109   :  { %v156_v31 = vmul.f32 0.70710677, %v150_v29  ;;  %v154_v36 = vmul.f32 0.5, %v150_v29 }
 0x10b   :  { %251 = verf.f32 %v156_v31 }
 0x114   :  { %v250_v32 = vpop.eup %249 }
 0x115   :  { %v159_v33 = vadd.f32 1.0, %v250_v32 }
 0x117   :  { %v161_v38 = vmul.f32 %v159_v33, %v153_v35 }
 0x118   :  { %v252_v34 = vpop.eup %251 }
 0x119   :  { %v160_v37 = vadd.f32 1.0, %v252_v34 }
 0x11b   :  { %v162_v39 = vmul.f32 %v160_v37, %v154_v36 }
 0x11d   :  { %v163_v40 = vpack.c.bf16 %v162_v39, %v161_v38 }
 0x11f   :  { %v164_v41 = vunpack.c.l.bf16 %v163_v40  ;;  %v165_v43 = vunpack.c.h.bf16 %v163_v40 }
 0x121   :  { %v166_v42 = vmul.f32 %v164_v41, %v164_v41  ;;  %v167_v44 = vmul.f32 %v165_v43, %v165_v43 }
 0x123   :  { %168 = vadd.xlane.f32.xlu0 %v166_v42 }
 0x127   :  { %170 = vadd.xlane.f32.xlu0 %v167_v44 }
 0x1ac   :  { %v169_v45 = vpop.xlane.xlu0 %168 }
 0x1ad   :  { %253 = vrsqrt.f32 %v169_v45 }
 0x1b0   :  { %v171_v46 = vpop.xlane.xlu0 %170 }
 0x1b1   :  { %255 = vrsqrt.f32 %v171_v46 }
 0x1ba   :  { %v254_v47 = vpop.eup %253 }
 0x1bb   :  { %v174_v49 = vmul.f32 %v254_v47, %v164_v41 }
 0x1be   :  { %v256_v48 = vpop.eup %255 }
 0x1bf   :  { %v175_v50 = vmul.f32 %v256_v48, %v165_v43 }
 0x1c1   :  { %v207_v51 = vpack.c.bf16 %v175_v50, %v174_v49 }
 0x1c3   :  { %208 = vst [vmem:[%s324_s3] sm:$0xff] %v207_v51  }

</bundles_post_ra>
